<compile_context>
chip_gen: v5e
topology: v5e:2x2
jax: 0.10.0
libtpu: 0.0.40
codegen_flags: <defaults>
</compile_context>

<pallas_src>
import math

import jax
import jax.numpy as jnp
from jax.experimental import pallas as pl
from jax.experimental.pallas import tpu as pltpu


def _copy_kernel(x_ref, o_ref):
    # Identity copy of the current (tm, lanes) block. Purely HBM-DMA bound.
    o_ref[...] = x_ref[...]


_LANE_CANDIDATES = (4096, 2048, 1024, 512, 256, 128)   # lane-dense widths (mult. of 128)
_TARGET_BLOCK_BYTES = 4 << 20    # ~4 MiB/block: 4x (dbl-buffered in+out) fits 32 MiB scoped VMEM (v7x-safe)
_MAX_BLOCK_BYTES = 16 << 20      # hard cap; beyond this the copy kernel is skipped


def _plan_slab(total, itemsize):
    """Pick (rows, lanes, rows_per_block) for a lane-dense tiled copy, or None."""
    lanes = next((c for c in _LANE_CANDIDATES if total % c == 0), None)
    if lanes is None:
        return None
    rows = total // lanes

    # Rows per block: as many as fit the ~4 MiB target, must divide `rows`
    # and satisfy the (8, 128) block constraint (multiple of 8 or == rows).
    cap = max(1, _TARGET_BLOCK_BYTES // (lanes * itemsize))
    tm = None
    for cand in range(min(rows, cap), 0, -1):
        if rows % cand == 0 and (cand % 8 == 0 or cand == rows):
            tm = cand
            break
    if tm is None:
        tm = rows
    if tm * lanes * itemsize > _MAX_BLOCK_BYTES:
        return None
    return rows, lanes, tm


def unflatten(x, new_shape, *, use_kernel=True):
    """Equivalent of torch `x.view(-1, *new_shape)`.

    With use_kernel=False (recommended production path) this is the free
    metadata reshape.  With use_kernel=True the bytes are routed through a
    Pallas identity-copy kernel tiled as large lane-dense row blocks.
    """
    feat = int(math.prod(new_shape))
    total = int(math.prod(x.shape))
    assert total % feat == 0, "input size not divisible by prod(new_shape)"
    batch = total // feat

    if not use_kernel:
        return x.reshape(batch, *new_shape)   # zero-cost view, same as torch

    itemsize = jnp.dtype(x.dtype).itemsize
    plan = _plan_slab(total, itemsize)
    if plan is None:
        # No clean lane-dense tiling (or a block would exceed the VMEM cap):
        # the op is a pure view, so the metadata reshape IS the optimal path.
        return x.reshape(batch, *new_shape)

    rows, lanes, tm = plan
    slab = x.reshape(rows, lanes)   # glue: row-major flatten (matches torch .view)

    out = pl.pallas_call(
        _copy_kernel,
        out_shape=jax.ShapeDtypeStruct((rows, lanes), x.dtype),
        grid=(rows // tm,),
        in_specs=[pl.BlockSpec((tm, lanes), lambda i: (i, 0))],
        out_specs=pl.BlockSpec((tm, lanes), lambda i: (i, 0)),
        input_output_aliases={0: 0},   # don't keep two HBM copies live
        compiler_params=pltpu.CompilerParams(
            dimension_semantics=("parallel",),
        ),
    )(slab)

    return out.reshape(batch, *new_shape)   # glue: final view


if __name__ == "__main__":
    key = jax.random.PRNGKey(0)

    # Module has no parameters; new_shape chosen consistent with a small
    # conv feature map: (C=4, H=16, W=16), batch=2, input given flattened.
    new_shape = (4, 16, 16)
    B = 2
    x = jax.random.normal(key, (B, 4 * 16 * 16), dtype=jnp.float32)

    y = unflatten(x, new_shape, use_kernel=True)
    y = jax.block_until_ready(y)

    ref = x.reshape(-1, *new_shape)           # == torch .view semantics
    assert y.shape == (B, 4, 16, 16)
    assert y.dtype == x.dtype
    assert bool(jnp.array_equal(y, ref))

    # Also exercise the fallback path (feat not a multiple of 128 -> pure reshape).
    new_shape2 = (3, 5, 7)
    x2 = jax.random.normal(jax.random.PRNGKey(1), (2, 3 * 5 * 7), dtype=jnp.float32)
    y2 = jax.block_until_ready(unflatten(x2, new_shape2, use_kernel=True))
    assert y2.shape == (2, 3, 5, 7)
    assert bool(jnp.array_equal(y2, x2.reshape(-1, *new_shape2)))

    # Recommended production path: zero-cost reshape, no kernel.
    y3 = jax.block_until_ready(unflatten(x, new_shape, use_kernel=False))
    assert bool(jnp.array_equal(y3, ref))

    print("KERNEL_OK")
</pallas_src>

<mosaic_0001>
module attributes {stable_mosaic.version = 11 : i64} {
  func.func @_copy_kernel(%arg0: i32, %arg1: memref<1x2048xf32, #tpu.memory_space<vmem>>, %arg2: memref<1x2048xf32, #tpu.memory_space<vmem>>) attributes {dimension_semantics = [#tpu.dimension_semantics<parallel>], iteration_bounds = array<i64: 1>, scalar_prefetch = 0 : i64, scratch_operands = 0 : i64, tpu.core_type = #tpu.core_type<tc>, window_params = [{transform_indices = @transform_0, window_bounds = array<i64: 1, 2048>}, {transform_indices = @transform_1, window_bounds = array<i64: 1, 2048>}]} {
    %c0 = arith.constant 0 : index
    %c0_0 = arith.constant 0 : index
    %0 = vector.load %arg1[%c0, %c0_0] : memref<1x2048xf32, #tpu.memory_space<vmem>>, vector<1x2048xf32>
    %c0_1 = arith.constant 0 : index
    %c0_2 = arith.constant 0 : index
    %1 = vector.load %arg2[%c0_1, %c0_2] : memref<1x2048xf32, #tpu.memory_space<vmem>>, vector<1x2048xf32>
    tpu.vector_store %arg2[%c0_1, %c0_2], %0 {strides = array<i32>} : memref<1x2048xf32, #tpu.memory_space<vmem>>, vector<1x2048xf32>,
    return
  }
  func.func @transform_0(%arg0: i32) -> (i32, i32) {
    %c0_i32 = arith.constant 0 : i32
    %c0_i32_0 = arith.constant 0 : i32
    return %arg0, %c0_i32 : i32, i32
  }
  func.func @transform_1(%arg0: i32) -> (i32, i32) {
    %c0_i32 = arith.constant 0 : i32
    %c0_i32_0 = arith.constant 0 : i32
    return %arg0, %c0_i32 : i32, i32
  }
}

</mosaic_0001>

<bundles_post_ra>
// kernel: tpu_custom_call.1
= control target key start
LH: loop header
LB: loop body
LE: loop exit
PB: predicated region body
PF: predicated region fallthrough
CT: control target
= control target key end

     0   :  { %6 = vsyncpa [#allocation3], 0  ;;  %s116_s0 = inlined_call_operand.hbm [shape: f32[1,2048], index: 0, kind: input, shape index: {}, may-alias: {0,1}]   ;;  %s117_s1 = inlined_call_operand.hbm [shape: f32[1,2048], index: 1, kind: output, shape index: {}, may-alias: {0,1}]  }
   0x1   :  { %7 = vsyncpa [#allocation4], 0  ;;  %s13_s8 = sshll.u32 %s116_s0, 4  ;;  %s98_s9 = smov [#allocation2]   ;;  %s14_s8 = int_to_ptr.hbm [resolvable:$true] %s13_s8 }
   0x2   :  { %s15_s10 = sshll.u32 %s98_s9, 4  ;;  %s16_s10 = int_to_ptr.vmem [resolvable:$true] %s15_s10 }
   0x3   :  { %18 = dma.hbm_to_vmem [thread:$0]  %s14_s8, 256, %s16_s10, [#allocation3]  }
   0x4   :  { %94 = dma.done.wait [#allocation3], 256  }
   0x5   :  { %95 = vsyncadd [#allocation3], 4294967040  ;;  %s99_s11 = smov [#allocation5]   ;;  %s34_s15 = sshll.u32 %s117_s1, 4  ;;  %v23_v0 = vld [vmem:[#allocation2] sm:$0xff]  ;;  %v24_v1 = vld [vmem:[#allocation2 + $0x8] sm:$0xff]  ;;  %s35_s15 = int_to_ptr.hbm [resolvable:$true] %s34_s15 }
   0x6   :  { %s32_s12 = sshll.u32 %s99_s11, 4  ;;  %25 = vst [vmem:[#allocation5] sm:$0xff] %v23_v0  ;;  %s33_s12 = int_to_ptr.vmem [resolvable:$true] %s32_s12 }
   0x7   :  { %26 = vst [vmem:[#allocation5 + $0x8] sm:$0xff] %v24_v1 }
   0x8   :  { %37 = dma.vmem_to_hbm [thread:$0]  %s33_s12, 256, %s35_s15, [#allocation4]  }
   0x9   :  { %96 = dma.done.wait [#allocation4], 256  }
   0xa   :  { %97 = vsyncadd [#allocation4], 4294967040 }
   0xb   :  { %42 = vsyncpa [#allocation3], 1 }
   0xc   :  { %43 = vsyncpa [#allocation4], 1 }

</bundles_post_ra>
